<compile_context>
chip_gen: v5e
topology: v5e:2x2
jax: 0.10.0
libtpu: 0.0.40
codegen_flags: <defaults>
</compile_context>

<pallas_src>
import math

import jax
import jax.numpy as jnp
from jax.experimental import pallas as pl
from jax.experimental.pallas import tpu as pltpu

SELU_ALPHA = 1.6732632423543772848170429916717
SELU_SCALE = 1.0507009873554804934193349852946

LANE = 128            # TPU lane width: hidden + classifier dims are padded to this
DEFAULT_TM = 256      # adj row tile
DEFAULT_TK = 2048     # adj contraction tile (only used when N is large & 128-aligned)
VMEM_LIMIT = 32 * 1024 * 1024


def _selu(v):
    # exp only over the non-positive branch (keeps the unselected lanes finite).
    return SELU_SCALE * jnp.where(
        v > 0.0, v, SELU_ALPHA * (jnp.exp(jnp.minimum(v, 0.0)) - 1.0))


def _round_up(n, m):
    return ((n + m - 1) // m) * m


def _pick_row_tile(n, pref=DEFAULT_TM):
    # pref is a multiple of 8; a partial last row block is handled by masked writeback.
    return n if n <= pref else pref


def _pick_k_tile(n, pref=DEFAULT_TK):
    # The contraction tile must divide N exactly (no padded garbage may enter the
    # accumulation) and be a multiple of 128 (lane-aligned last dim of the adj block),
    # otherwise fall back to a single full-K step.
    if n <= pref or n % LANE != 0:
        return n
    t = pref - pref % LANE
    while n % t:
        t -= LANE
    return t


# ---------------- kernel 1: row-tiled feature transform  s = x @ W --------------------
def _xw_kernel(x_ref, w_ref, out_ref):
    out_ref[...] = jnp.dot(x_ref[...], w_ref[...], preferred_element_type=jnp.float32)


def _xw(x, w, tm):
    n, in_dim = x.shape
    hpad = w.shape[1]
    nb = pl.cdiv(n, tm)
    return pl.pallas_call(
        _xw_kernel,
        out_shape=jax.ShapeDtypeStruct((n, hpad), jnp.float32),
        grid=(nb,),
        in_specs=[pl.BlockSpec((tm, in_dim), lambda i: (i, 0)),
                  pl.BlockSpec((in_dim, hpad), lambda i: (0, 0))],
        out_specs=pl.BlockSpec((tm, hpad), lambda i: (i, 0)),
        compiler_params=pltpu.CompilerParams(
            dimension_semantics=("parallel",),
            vmem_limit_bytes=VMEM_LIMIT),
        cost_estimate=pl.CostEstimate(
            flops=2 * n * in_dim * hpad,
            transcendentals=0,
            bytes_accessed=4 * (n * in_dim + in_dim * hpad + n * hpad)),
    )(x, w)


# ---------------- kernel 2: GCN layer with folded post-matmul -------------------------
#   out_row_block = (selu(adj_row_block @ s_full) + b) @ W_post + b_post
# adj is tiled (TM, TK) over a (rows, K) grid; s/weights/biases are VMEM-resident.
def _gcn_layer(adj, s, b, w_post, b_post, tm, tk):
    n = adj.shape[0]
    hpad = s.shape[1]
    cout = w_post.shape[1]
    nb = pl.cdiv(n, tm)
    nk = n // tk                      # tk divides n by construction

    def kernel(adj_ref, s_ref, b_ref, wp_ref, bp_ref, out_ref, acc_ref):
        k = pl.program_id(1)

        @pl.when(k == 0)
        def _init():
            acc_ref[...] = jnp.zeros_like(acc_ref)

        k0 = pl.multiple_of(k * tk, tk)
        acc_ref[...] += jnp.dot(adj_ref[...], s_ref[pl.ds(k0, tk), :],
                                preferred_element_type=jnp.float32)

        @pl.when(k == pl.num_programs(1) - 1)
        def _finalize():
            h = _selu(acc_ref[...]) + b_ref[...]     # bias added AFTER activation
            out_ref[...] = (jnp.dot(h, wp_ref[...],
                                    preferred_element_type=jnp.float32)
                            + bp_ref[...])

    return pl.pallas_call(
        kernel,
        out_shape=jax.ShapeDtypeStruct((n, cout), jnp.float32),
        grid=(nb, nk),
        in_specs=[
            pl.BlockSpec((tm, tk), lambda i, k: (i, k)),      # adj tile (streamed)
            pl.BlockSpec((n, hpad), lambda i, k: (0, 0)),     # s: resident, DMA'd once
            pl.BlockSpec((1, hpad), lambda i, k: (0, 0)),     # post-activation bias
            pl.BlockSpec((hpad, cout), lambda i, k: (0, 0)),  # folded post-weight
            pl.BlockSpec((1, cout), lambda i, k: (0, 0)),     # folded post-bias
        ],
        out_specs=pl.BlockSpec((tm, cout), lambda i, k: (i, 0)),   # lane-dense (128)
        scratch_shapes=[pltpu.VMEM((tm, hpad), jnp.float32)],
        compiler_params=pltpu.CompilerParams(
            dimension_semantics=("parallel", "arbitrary"),
            vmem_limit_bytes=VMEM_LIMIT),
        cost_estimate=pl.CostEstimate(
            flops=2 * n * n * hpad + 2 * n * hpad * cout,
            transcendentals=n * hpad,
            bytes_accessed=4 * (n * n + n * hpad + hpad * cout + n * cout)),
    )(adj, s, b, w_post, b_post)


def gcn_forward(x, adj, padded_params, out_dim,
                *, block_rows=DEFAULT_TM, block_k=DEFAULT_TK):
    """Runs the tiled Pallas kernels and splits the concatenated logits per head."""
    w1p, b1p, w2p, b2p, wcp, bcp = padded_params
    n = x.shape[0]
    c_total = sum(out_dim)
    tm = _pick_row_tile(n, block_rows)
    tk = _pick_k_tile(n, block_k)

    s1 = _xw(x, w1p, tm)                                     # (n, 128) = x @ W1
    zeros_h = jnp.zeros_like(b1p)
    s2 = _gcn_layer(adj, s1, b1p, w2p, zeros_h, tm, tk)      # (n, 128) = h1 @ W2
    logits_pad = _gcn_layer(adj, s2, b2p, wcp, bcp, tm, tk)  # (n, Cpad) = h2 @ Wc + bc

    logits = logits_pad[:, :c_total]
    outs, off = [], 0
    for c in out_dim:
        outs.append(logits[:, off:off + c])
        off += c
    return outs


def init_params(key, in_dim, in_dim2, out_dim, *, hpad=LANE):
    """Parameter init mirroring the module (act_func='xn' -> 'selu_xn'):
       GC weights: xavier_normal(gain=3/4); classifier heads: xavier_normal(gain=1);
       biases zero.  Returns (padded_params_for_kernel, raw_params_for_reference)."""
    c_total = sum(out_dim)
    cpad = _round_up(max(c_total, 1), LANE)
    k1, k2, *kc = jax.random.split(key, 2 + len(out_dim))

    def xavier_normal(k, fan_in, fan_out, gain):
        std = gain * math.sqrt(2.0 / (fan_in + fan_out))
        return std * jax.random.normal(k, (fan_in, fan_out), dtype=jnp.float32)

    # real (unpadded) parameters
    w1 = xavier_normal(k1, in_dim, in_dim2, 3.0 / 4.0)
    w2 = xavier_normal(k2, in_dim2, in_dim2, 3.0 / 4.0)
    wc = jnp.concatenate(
        [xavier_normal(k, in_dim2, c, 1.0) for k, c in zip(kc, out_dim)], axis=1)
    b1 = jnp.zeros((1, in_dim2), jnp.float32)
    b2 = jnp.zeros((1, in_dim2), jnp.float32)
    bc = jnp.zeros((1, c_total), jnp.float32)

    # zero-padded lane-dense layouts for the kernels (padding columns are exactly zero)
    w1p = jnp.zeros((in_dim, hpad), jnp.float32).at[:, :in_dim2].set(w1)
    w2p = jnp.zeros((hpad, hpad), jnp.float32).at[:in_dim2, :in_dim2].set(w2)
    wcp = jnp.zeros((hpad, cpad), jnp.float32).at[:in_dim2, :c_total].set(wc)
    b1p = jnp.zeros((1, hpad), jnp.float32).at[:, :in_dim2].set(b1)
    b2p = jnp.zeros((1, hpad), jnp.float32).at[:, :in_dim2].set(b2)
    bcp = jnp.zeros((1, cpad), jnp.float32).at[:, :c_total].set(bc)

    padded = (w1p, b1p, w2p, b2p, wcp, bcp)
    raw = (w1, b1, w2, b2, wc, bc)
    return padded, raw


def reference_forward(x, adj, raw_params, out_dim):
    w1, b1, w2, b2, wc, bc = raw_params
    h1 = _selu(adj @ (x @ w1)) + b1
    h2 = _selu(adj @ (h1 @ w2)) + b2
    out_cat = h2 @ wc + bc
    outs, off = [], 0
    for c in out_dim:
        outs.append(out_cat[:, off:off + c])
        off += c
    return outs


if __name__ == "__main__":
    # small shapes consistent with the module
    N = 512                           # number of graph nodes (2 row tiles of 256)
    in_dim = 64                       # input feature dim
    in_dim2 = int(math.log(in_dim))   # = 4 (hidden dim, as in the module)
    out_dim = [3, 5]                  # multi-head classifier class counts

    key = jax.random.PRNGKey(0)
    kx, kadj, kp = jax.random.split(key, 3)

    x = jax.random.normal(kx, (N, in_dim), dtype=jnp.float32)
    # dense (normalized) adjacency; torch.sparse.mm(adj, support) == adj @ support
    adj_raw = (jax.random.uniform(kadj, (N, N)) < 0.05).astype(jnp.float32)
    adj = adj_raw + jnp.eye(N, dtype=jnp.float32)
    adj = adj / jnp.sum(adj, axis=1, keepdims=True)

    padded_params, raw_params = init_params(kp, in_dim, in_dim2, out_dim)

    outs = gcn_forward(x, adj, padded_params, out_dim)
    outs = [jax.block_until_ready(o) for o in outs]

    refs = reference_forward(x, adj, raw_params, out_dim)
    for o, r, c in zip(outs, refs, out_dim):
        assert o.shape == (N, c), o.shape
        assert jnp.allclose(o, r, atol=1e-4, rtol=1e-4), \
            float(jnp.max(jnp.abs(o - r)))

    print("KERNEL_OK")
</pallas_src>

<mosaic_0001>
module attributes {stable_mosaic.version = 11 : i64} {
  func.func @_xw_kernel(%arg0: i32, %arg1: memref<256x64xf32, #tpu.memory_space<vmem>>, %arg2: memref<64x128xf32, #tpu.memory_space<vmem>>, %arg3: memref<256x128xf32, #tpu.memory_space<vmem>>) attributes {dimension_semantics = [#tpu.dimension_semantics<parallel>], iteration_bounds = array<i64: 2>, scalar_prefetch = 0 : i64, scratch_operands = 0 : i64, tpu.core_type = #tpu.core_type<tc>, window_params = [{transform_indices = @transform_0, window_bounds = array<i64: 256, 64>}, {pipeline_mode = #tpu.pipeline_mode<synchronous>, transform_indices = @transform_1, window_bounds = array<i64: 64, 128>}, {transform_indices = @transform_2, window_bounds = array<i64: 256, 128>}]} {
    %c0 = arith.constant 0 : index
    %c0_0 = arith.constant 0 : index
    %0 = vector.load %arg1[%c0, %c0_0] : memref<256x64xf32, #tpu.memory_space<vmem>>, vector<256x64xf32>
    %c0_1 = arith.constant 0 : index
    %c0_2 = arith.constant 0 : index
    %1 = vector.load %arg2[%c0_1, %c0_2] : memref<64x128xf32, #tpu.memory_space<vmem>>, vector<64x128xf32>
    %cst = arith.constant dense<0.000000e+00> : vector<256x128xf32>
    %2 = tpu.matmul %0, %1, %cst {dimension_numbers = #tpu.dot_dimension_numbers<[1], [0], [0], [1], [0, 0, 1, 1], [], []>} : vector<256x64xf32>, vector<64x128xf32>, vector<256x128xf32> -> vector<256x128xf32>
    %c0_3 = arith.constant 0 : index
    %c0_4 = arith.constant 0 : index
    %3 = vector.load %arg3[%c0_3, %c0_4] : memref<256x128xf32, #tpu.memory_space<vmem>>, vector<256x128xf32>
    tpu.vector_store %arg3[%c0_3, %c0_4], %2 {strides = array<i32>} : memref<256x128xf32, #tpu.memory_space<vmem>>, vector<256x128xf32>,
    return
  }
  func.func @transform_0(%arg0: i32) -> (i32, i32) {
    %c0_i32 = arith.constant 0 : i32
    %c0_i32_0 = arith.constant 0 : i32
    return %arg0, %c0_i32 : i32, i32
  }
  func.func @transform_1(%arg0: i32) -> (i32, i32) {
    %c0_i32 = arith.constant 0 : i32
    %c0_i32_0 = arith.constant 0 : i32
    %c0_i32_1 = arith.constant 0 : i32
    return %c0_i32, %c0_i32_0 : i32, i32
  }
  func.func @transform_2(%arg0: i32) -> (i32, i32) {
    %c0_i32 = arith.constant 0 : i32
    %c0_i32_0 = arith.constant 0 : i32
    return %arg0, %c0_i32 : i32, i32
  }
}

</mosaic_0001>

<bundles_post_ra>
// kernel: tpu_custom_call.1
= control target key start
LH: loop header
LB: loop body
LE: loop exit
PB: predicated region body
PF: predicated region fallthrough
CT: control target
= control target key end

     0   :  { %7 = vsyncpa [#allocation3], 0  ;;  %s909_s0 = inlined_call_operand.vmem [shape: f32[512,64], index: 0, kind: input, shape index: {}]   ;;  %s910_s1 = inlined_call_operand.vmem [shape: f32[64,128], index: 1, kind: input, shape index: {}]   ;;  %s911_s2 = inlined_call_operand.hbm [shape: f32[512,128], index: 2, kind: output, shape index: {}]  }
   0x1   :  { %9 = vsyncpa [#allocation3 + $0x1], 0  ;;  %s696_s9 = smov 0   ;;  %s698_s10 = smov 0  }
   0x2   :  { %s700_s11 = smov 0   ;;  %s702_s12 = smov 0  }
   0x3 LB: > { %s717_s13 = sadd.s32 4294967295, %s677_s12   ;;  %s505_s14 = sadd.s32 4294967294, %s677_s12   ;;  %s677_s12 = sphi %s702_s12, %s917_s12   ;;  %s673_s11 = sphi %s700_s11, %s916_s11   ;;  %s669_s10 = sphi %s698_s10, %s915_s10   ;;  %s665_s9 = sphi %s696_s9, %s914_s9  }
   0x4   : > { %s721_s15 = sadd.s32 1, %s677_s12   ;;  %s69_s16 = sadd.s32 1, %s673_s11 }
   0x5   : > { %s66_s17 = ssub.s32 %s677_s12, %s721_s15  ;;  %p79_p0 = scmp.ne.s32.totalorder %s673_s11, %s669_s10 }
   0x6   : > { %p67_p1 = scmp.eq.s32.totalorder %s66_s17, 0  ;;  %p80_p2 = scmp.eq.s32.totalorder %s717_s13, 1 }
   0x7   : > { %p85_p3 = scmp.ne.s32.totalorder %s669_s10, %s665_s9  ;;  %p86_p4 = scmp.eq.s32.totalorder %s505_s14, 1 }
   0x8   : > { %s732_s18 = scalar_select %p67_p1, %s673_s11, %s69_s16  }
   0x9   : > { %p734_p5 = por %p80_p2, %p79_p0  ;;  %p738_p6 = por %p86_p4, %p85_p3 }
   0xa   : > { %p508_p7 = scmp.ge.s32.totalorder %s677_s12, 1  ;;  %p116_p8 = scmp.lt.s32.totalorder %s677_s12, 3 }
   0xc   : > { %p117_p9 = pnand %p508_p7, %p116_p8 }
   0xd   : > { %s510_s25 = sshll.u32 (!%p117_p9), %s717_s13, 5  ;;  %s135_s23 = sand.u32 (!%p117_p9), 1, %s669_s10  }
   0xe   : > { %120 = sbr.rel (%p117_p9) target bundleno = 228 (0xe4), region = 28  ;;  %p139_p10 = scmp.lt.s32.totalorder (!%p117_p9), %s510_s25, 63 }
   0xf   : > { %s509_s24 = sshll.u32 (!%p117_p9), %s135_s23, 8  ;;  %s549_s26 = sshll.u32 (!%p117_p9), %s717_s13, 8 }
  0x10   : > { %s439_s29 = scalar_lea.hbm (!%p117_p9), %s911_s2, %s549_s26  ;;  %s428_s13 = scalar_lea.sflag (!%p117_p9), [#allocation3], %s135_s23 }
  0x11   : > { %s442_s3 = sshll.u32 (!%p117_p9), %s439_s29, 4  ;;  %s635_s8 = scalar_lea.hbm (!%p117_p9), %s911_s2, 512  ;;  %s443_s3 = int_to_ptr.hbm [resolvable:$true] %s442_s3 }
  0x13   : > { %v184_v0 = vld [vmem:[%s910_s1 + $0x38] sm:$0xff]  ;;  %v183_v1 = vld [vmem:[%s910_s1 + $0x30] sm:$0xff]  ;;  %v182_v2 = vld [vmem:[%s910_s1 + $0x28] sm:$0xff]  ;;  %s919_s25 = smov (!%p139_p10, %s510_s25), 63  ;;  %vm185_vm0 = vcmask 523264  }
  0x14   : > { %551 = vmatpush.msra.mxu2 %v184_v0  ;;  %552 = vmatpush.msra.mxu3 %v184_v0  ;;  %v181_v3 = vld [vmem:[%s910_s1 + $0x20] sm:$0xff]  ;;  %v180_v4 = vld [vmem:[%s910_s1 + $0x18] sm:$0xff]  ;;  %s511_s4 = sshll.u32 %s919_s25, 3  ;;  %v179_v5 = vld [vmem:[%s910_s1 + $0x10] sm:$0xff]  ;;  %s841_s25 = scalar_lea.vmem [#allocation2], %s509_s24 }
  0x15   : > { %290 = vmatpush.msra.mxu0 %v184_v0  ;;  %550 = vmatpush.msra.mxu1 %v184_v0  ;;  %v178_v6 = vld [vmem:[%s910_s1 + $0x8] sm:$0xff]  ;;  %s769_s17 = scalar_lea.vmem %s909_s0, %s511_s4  ;;  %v177_v7 = vld [vmem:[%s910_s1] sm:$0xff]  ;;  %s440_s30 = sshll.u32 %s841_s25, 4  ;;  %s441_s30 = int_to_ptr.vmem [resolvable:$true] %s440_s30 }
  0x16   : > { %554 = vmatpush.msra.mxu2 %v183_v1  ;;  %555 = vmatpush.msra.mxu3 %v183_v1  ;;  %v161_v8 = vld [vmem:[%s769_s17 + $0x80] sm:$0xff]  ;;  %v162_v12 = vld [vmem:[%s769_s17 + $0x88] sm:$0xff]  ;;  %v163_v16 = vld [vmem:[%s769_s17 + $0x90] sm:$0xff]  ;;  %s629_s4 = sshra.s32 %s443_s3, 4  ;;  %s630_s4 = int_to_ptr.hbm [resolvable:$true] %s629_s4 }
  0x17   : > { %291 = vmatpush.msra.mxu0 %v183_v1  ;;  %553 = vmatpush.msra.mxu1 %v183_v1  ;;  %v169_v9 = vld [vmem:[%s769_s17 + $0xc0] sm:$0xff]  ;;  %v170_v13 = vld [vmem:[%s769_s17 + $0xc8] sm:$0xff]  ;;  %v171_v17 = vld [vmem:[%s769_s17 + $0xd0] sm:$0xff]  ;;  %s631_s5 = scalar_lea.hbm %s630_s4, 256  ;;  %p636_p0 = scmp.lt.s32.totalorder %s630_s4, %s911_s2 }
  0x18   : > { %557 = vmatpush.msra.mxu2 %v182_v2  ;;  %558 = vmatpush.msra.mxu3 %v182_v2  ;;  %v145_v10 = vld [vmem:[%s769_s17] sm:$0xff]  ;;  %v146_v14 = vld [vmem:[%s769_s17 + $0x8] sm:$0xff]  ;;  %v147_v18 = vld [vmem:[%s769_s17 + $0x10] sm:$0xff]  ;;  %p632_p11 = scmp.ne.s32.totalorder %s630_s4, %s631_s5  ;;  %p637_p1 = scmp.lt.s32.totalorder %s635_s8, %s631_s5 }
  0x19   : > { %292 = vmatpush.msra.mxu0 %v182_v2  ;;  %556 = vmatpush.msra.mxu1 %v182_v2  ;;  %v153_v11 = vld [vmem:[%s769_s17 + $0x40] sm:$0xff]  ;;  %v154_v15 = vld [vmem:[%s769_s17 + $0x48] sm:$0xff]  ;;  %v155_v19 = vld [vmem:[%s769_s17 + $0x50] sm:$0xff] }
  0x1a   : > { %560 = vmatpush.msra.mxu2 %v181_v3  ;;  %561 = vmatpush.msra.mxu3 %v181_v3  ;;  %v164_v20 = vld [vmem:[%s769_s17 + $0x98] sm:$0xff]  ;;  %v165_v24 = vld [vmem:[%s769_s17 + $0xa0] sm:$0xff]  ;;  %v166_v28 = vld [vmem:[%s769_s17 + $0xa8] sm:$0xff]  ;;  %p633_p12 = pnand %p632_p11, %p734_p5  ;;  %p638_p2 = por %p637_p1, %p636_p0 }
  0x1b   : > { %293 = vmatpush.msra.mxu0 %v181_v3  ;;  %559 = vmatpush.msra.mxu1 %v181_v3  ;;  %v172_v21 = vld [vmem:[%s769_s17 + $0xd8] sm:$0xff]  ;;  %v173_v25 = vld [vmem:[%s769_s17 + $0xe0] sm:$0xff]  ;;  %v174_v29 = vld [vmem:[%s769_s17 + $0xe8] sm:$0xff] }
  0x1c   : > { %563 = vmatpush.msra.mxu2 %v180_v4  ;;  %564 = vmatpush.msra.mxu3 %v180_v4  ;;  %v148_v22 = vld [vmem:[%s769_s17 + $0x18] sm:$0xff]  ;;  %v149_v26 = vld [vmem:[%s769_s17 + $0x20] sm:$0xff]  ;;  %v150_v30 = vld [vmem:[%s769_s17 + $0x28] sm:$0xff]  ;;  %p634_p13 = pneg %p633_p12 }
  0x1d   : > { %294 = vmatpush.msra.mxu0 %v180_v4  ;;  %562 = vmatpush.msra.mxu1 %v180_v4  ;;  %v156_v23 = vld [vmem:[%s769_s17 + $0x58] sm:$0xff]  ;;  %v157_v27 = vld [vmem:[%s769_s17 + $0x60] sm:$0xff]  ;;  %v158_v31 = vld [vmem:[%s769_s17 + $0x68] sm:$0xff] }
  0x1e   : > { %566 = vmatpush.msra.mxu2 %v179_v5  ;;  %567 = vmatpush.msra.mxu3 %v179_v5  ;;  %v167_v32 = vld [vmem:[%s769_s17 + $0xb0] sm:$0xff]  ;;  %v168_v36 = vld [vmem:[%s769_s17 + $0xb8] sm:$0xff]  ;;  %p639_p3 = pnand %p638_p2, %p634_p13 }
  0x1f   : > { %295 = vmatpush.msra.mxu0 %v179_v5  ;;  %565 = vmatpush.msra.mxu1 %v179_v5  ;;  %v175_v33 = vld [vmem:[%s769_s17 + $0xf0] sm:$0xff]  ;;  %v176_v37 = vld [vmem:[%s769_s17 + $0xf8] sm:$0xff] }
  0x20   : > { %569 = vmatpush.msra.mxu2 %v178_v6  ;;  %570 = vmatpush.msra.mxu3 %v178_v6  ;;  %v151_v34 = vld [vmem:[%s769_s17 + $0x30] sm:$0xff]  ;;  %v152_v38 = vld [vmem:[%s769_s17 + $0x38] sm:$0xff] }
  0x21   : > { %296 = vmatpush.msra.mxu0 %v178_v6  ;;  %568 = vmatpush.msra.mxu1 %v178_v6  ;;  %v159_v35 = vld [vmem:[%s769_s17 + $0x70] sm:$0xff]  ;;  %v160_v39 = vld [vmem:[%s769_s17 + $0x78] sm:$0xff] }
  0x22   : > { %572 = vmatpush.msra.mxu2 %v177_v7  ;;  %573 = vmatpush.msra.mxu3 %v177_v7 }
  0x23   : > { %528 = vmatmul.msk.f32.vlgmr.msra.gmra.mxu2 %vm185_vm0, %v161_v8  ;;  %536 = vmatmul.msk.f32.vlgmr.msra.gmra.mxu3 %vm185_vm0, %v169_v9 }
  0x24   : > { %297 = vmatpush.msra.mxu0 %v177_v7  ;;  %571 = vmatpush.msra.mxu1 %v177_v7 }
  0x25   : > { %512 = vmatmul.msk.f32.vlgmr.msra.gmra.mxu0 %vm185_vm0, %v145_v10  ;;  %520 = vmatmul.msk.f32.vlgmr.msra.gmra.mxu1 %vm185_vm0, %v153_v11 }
  0x2b   : > { %529 = vmatmul.msk.f32.gmra.mxu2 %vm185_vm0, %v162_v12  ;;  %537 = vmatmul.msk.f32.gmra.mxu3 %vm185_vm0, %v170_v13 }
  0x2d   : > { %513 = vmatmul.msk.f32.gmra.mxu0 %vm185_vm0, %v146_v14  ;;  %521 = vmatmul.msk.f32.gmra.mxu1 %vm185_vm0, %v154_v15 }
  0x33   : > { %530 = vmatmul.msk.f32.gmra.mxu2 %vm185_vm0, %v163_v16  ;;  %538 = vmatmul.msk.f32.gmra.mxu3 %vm185_vm0, %v171_v17 }
  0x35   : > { %514 = vmatmul.msk.f32.gmra.mxu0 %vm185_vm0, %v147_v18  ;;  %522 = vmatmul.msk.f32.gmra.mxu1 %vm185_vm0, %v155_v19 }
  0x3b   : > { %531 = vmatmul.msk.f32.gmra.mxu2 %vm185_vm0, %v164_v20  ;;  %539 = vmatmul.msk.f32.gmra.mxu3 %vm185_vm0, %v172_v21 }
  0x3d   : > { %515 = vmatmul.msk.f32.gmra.mxu0 %vm185_vm0, %v148_v22  ;;  %523 = vmatmul.msk.f32.gmra.mxu1 %vm185_vm0, %v156_v23 }
  0x43   : > { %532 = vmatmul.msk.f32.gmra.mxu2 %vm185_vm0, %v165_v24  ;;  %540 = vmatmul.msk.f32.gmra.mxu3 %vm185_vm0, %v173_v25 }
  0x45   : > { %516 = vmatmul.msk.f32.gmra.mxu0 %vm185_vm0, %v149_v26  ;;  %524 = vmatmul.msk.f32.gmra.mxu1 %vm185_vm0, %v157_v27 }
  0x4b   : > { %533 = vmatmul.msk.f32.gmra.mxu2 %vm185_vm0, %v166_v28  ;;  %541 = vmatmul.msk.f32.gmra.mxu3 %vm185_vm0, %v174_v29 }
  0x4d   : > { %517 = vmatmul.msk.f32.gmra.mxu0 %vm185_vm0, %v150_v30  ;;  %525 = vmatmul.msk.f32.gmra.mxu1 %vm185_vm0, %v158_v31 }
  0x53   : > { %534 = vmatmul.msk.f32.gmra.mxu2 %vm185_vm0, %v167_v32  ;;  %542 = vmatmul.msk.f32.gmra.mxu3 %vm185_vm0, %v175_v33 }
  0x55   : > { %518 = vmatmul.msk.f32.gmra.mxu0 %vm185_vm0, %v151_v34  ;;  %526 = vmatmul.msk.f32.gmra.mxu1 %vm185_vm0, %v159_v35 }
  0x5b   : > { %535 = vmatmul.msk.f32.gmra.mxu2 %vm185_vm0, %v168_v36  ;;  %543 = vmatmul.msk.f32.gmra.mxu3 %vm185_vm0, %v176_v37 }
  0x5d   : > { %519 = vmatmul.msk.f32.gmra.mxu0 %vm185_vm0, %v152_v38  ;;  %527 = vmatmul.msk.f32.gmra.mxu1 %vm185_vm0, %v160_v39 }
  0xa2   : > { %v299_v40 = vpop.f32.mrf.mxu0  ;;  %v323_v41 = vpop.f32.mrf.mxu1 }
  0xa3   : > { %395 = vst [vmem:[%s841_s25] sm:$0xff] %v299_v40 }
  0xa4   : > { %403 = vst [vmem:[%s841_s25 + $0x40] sm:$0xff] %v323_v41 }
  0xa6   : > { %v347_v42 = vpop.f32.mrf.mxu2  ;;  %v371_v43 = vpop.f32.mrf.mxu3 }
  0xa7   : > { %411 = vst [vmem:[%s841_s25 + $0x80] sm:$0xff] %v347_v42 }
  0xa8   : > { %419 = vst [vmem:[%s841_s25 + $0xc0] sm:$0xff] %v371_v43 }
  0xaa   : > { %v302_v44 = vpop.f32.mrf.mxu0  ;;  %v326_v45 = vpop.f32.mrf.mxu1 }
  0xab   : > { %396 = vst [vmem:[%s841_s25 + $0x8] sm:$0xff] %v302_v44 }
  0xac   : > { %404 = vst [vmem:[%s841_s25 + $0x48] sm:$0xff] %v326_v45 }
  0xae   : > { %v350_v46 = vpop.f32.mrf.mxu2  ;;  %v374_v47 = vpop.f32.mrf.mxu3 }
  0xaf   : > { %412 = vst [vmem:[%s841_s25 + $0x88] sm:$0xff] %v350_v46 }
  0xb0   : > { %420 = vst [vmem:[%s841_s25 + $0xc8] sm:$0xff] %v374_v47 }
  0xb2   : > { %v305_v48 = vpop.f32.mrf.mxu0  ;;  %v329_v49 = vpop.f32.mrf.mxu1 }
  0xb3   : > { %397 = vst [vmem:[%s841_s25 + $0x10] sm:$0xff] %v305_v48 }
  0xb4   : > { %405 = vst [vmem:[%s841_s25 + $0x50] sm:$0xff] %v329_v49 }
  0xb6   : > { %v353_v50 = vpop.f32.mrf.mxu2  ;;  %v377_v51 = vpop.f32.mrf.mxu3 }
  0xb7   : > { %413 = vst [vmem:[%s841_s25 + $0x90] sm:$0xff] %v353_v50 }
  0xb8   : > { %421 = vst [vmem:[%s841_s25 + $0xd0] sm:$0xff] %v377_v51 }
  0xba   : > { %v308_v52 = vpop.f32.mrf.mxu0  ;;  %v332_v53 = vpop.f32.mrf.mxu1 }
  0xbb   : > { %398 = vst [vmem:[%s841_s25 + $0x18] sm:$0xff] %v308_v52 }
  0xbc   : > { %406 = vst [vmem:[%s841_s25 + $0x58] sm:$0xff] %v332_v53 }
  0xbe   : > { %v356_v54 = vpop.f32.mrf.mxu2  ;;  %v380_v55 = vpop.f32.mrf.mxu3 }
  0xbf   : > { %414 = vst [vmem:[%s841_s25 + $0x98] sm:$0xff] %v356_v54 }
  0xc0   : > { %422 = vst [vmem:[%s841_s25 + $0xd8] sm:$0xff] %v380_v55 }
  0xc2   : > { %v311_v56 = vpop.f32.mrf.mxu0  ;;  %v335_v57 = vpop.f32.mrf.mxu1 }
  0xc3   : > { %399 = vst [vmem:[%s841_s25 + $0x20] sm:$0xff] %v311_v56 }
  0xc4   : > { %407 = vst [vmem:[%s841_s25 + $0x60] sm:$0xff] %v335_v57 }
  0xc6   : > { %v359_v58 = vpop.f32.mrf.mxu2  ;;  %v383_v59 = vpop.f32.mrf.mxu3 }
  0xc7   : > { %415 = vst [vmem:[%s841_s25 + $0xa0] sm:$0xff] %v359_v58 }
  0xc8   : > { %423 = vst [vmem:[%s841_s25 + $0xe0] sm:$0xff] %v383_v59 }
  0xca   : > { %v314_v60 = vpop.f32.mrf.mxu0  ;;  %v338_v61 = vpop.f32.mrf.mxu1 }
  0xcb   : > { %400 = vst [vmem:[%s841_s25 + $0x28] sm:$0xff] %v314_v60 }
  0xcc   : > { %408 = vst [vmem:[%s841_s25 + $0x68] sm:$0xff] %v338_v61 }
  0xce   : > { %v362_v62 = vpop.f32.mrf.mxu2  ;;  %v386_v63 = vpop.f32.mrf.mxu3 }
  0xcf   : > { %416 = vst [vmem:[%s841_s25 + $0xa8] sm:$0xff] %v362_v62 }
  0xd0   : > { %424 = vst [vmem:[%s841_s25 + $0xe8] sm:$0xff] %v386_v63 }
  0xd2   : > { %v317_v0 = vpop.f32.mrf.mxu0  ;;  %v341_v1 = vpop.f32.mrf.mxu1 }
  0xd3   : > { %401 = vst [vmem:[%s841_s25 + $0x30] sm:$0xff] %v317_v0 }
  0xd4   : > { %409 = vst [vmem:[%s841_s25 + $0x70] sm:$0xff] %v341_v1 }
  0xd6   : > { %v365_v2 = vpop.f32.mrf.mxu2  ;;  %v389_v3 = vpop.f32.mrf.mxu3 }
  0xd7   : > { %417 = vst [vmem:[%s841_s25 + $0xb0] sm:$0xff] %v365_v2 }
  0xd8   : > { %425 = vst [vmem:[%s841_s25 + $0xf0] sm:$0xff] %v389_v3 }
  0xda   : > { %v320_v4 = vpop.f32.mrf.mxu0  ;;  %v344_v5 = vpop.f32.mrf.mxu1 }
  0xdb   : > { %402 = vst [vmem:[%s841_s25 + $0x38] sm:$0xff] %v320_v4 }
  0xdc   : > { %410 = vst [vmem:[%s841_s25 + $0x78] sm:$0xff] %v344_v5 }
  0xde   : > { %v368_v6 = vpop.f32.mrf.mxu2  ;;  %v392_v7 = vpop.f32.mrf.mxu3 }
  0xdf   : > { %418 = vst [vmem:[%s841_s25 + $0xb8] sm:$0xff] %v368_v6 }
  0xe0   : > { %426 = vst [vmem:[%s841_s25 + $0xf8] sm:$0xff] %v392_v7 }
  0xe1   : > { %642 = shalt.err (!%p639_p3)
}
  0xe2   : > { %s679_s17 = smov 128   ;;  %s680_s21 = smov 8  }
  0xe3   : > { %574 = dma.vmem_to_hbm [thread:$0]  (%p734_p5), %s441_s30, 4096, %s443_s3, %s428_s13, %s679_s17, %s679_s17, %s680_s21  }
  0xe4 PF: > { %p580_p4 = scmp.ge.s32.totalorder %s677_s12, 2  ;;  %s457_s22 = sand.u32 1, %s665_s9  }
  0xe5   : > { %s458_s23 = scalar_lea.sflag [#allocation3], %s457_s22 }
  0xe6   : > { %p577_p7 = pnand %p580_p4, %p738_p6 }
  0xe8   : > { %p578_p8 = pneg %p577_p7 }
  0xea   : > { %660 = dma.done.wait (%p578_p8), %s458_s23, 4096  }
  0xeb   : > { %662 = vsyncadd (%p578_p8), %s458_s23, 4294963200  ;;  %p12_p9 = scmp.ge.s32.totalorder %s721_s15, 4   ;;  %s914_s9 = smov %s669_s10 }
  0xec   : > { %s915_s10 = smov %s673_s11  ;;  %s916_s11 = smov %s732_s18 }
  0xed   : > { %s917_s12 = smov %s721_s15  ;;  %14 = sbr.rel (!%p12_p9) target bundleno = 3 (0x3), region = 63 }
  0xf2   :  { %464 = vsyncpa [#allocation3], 1 }
  0xf3   :  { %466 = vsyncpa [#allocation3 + $0x1], 1 }

</bundles_post_ra>
